<compile_context>
chip_gen: v5e
topology: v5e:2x2
jax: 0.10.0
libtpu: 0.0.40
codegen_flags: <defaults>
</compile_context>

<pallas_src>
import functools
import math

import jax
import jax.numpy as jnp
import numpy as np
from jax import lax
from jax.experimental import pallas as pl
from jax.experimental.pallas import tpu as pltpu


# --------------------------------------------------------------------------
# Phase 1: materialize W (as (n, vn, E), later reshaped to (V, E))
# --------------------------------------------------------------------------
def _build_w_kernel(a_ref, s_ref, w_ref, *, n, en):
    """a_ref: SMEM (n*n*n,) f32   -- A flattened, pre-scaled by sqrt(E)
       s_ref: VMEM (n, block_v, en) f32 block of S (rows q-block)
       w_ref: VMEM (1, block_v, E) f32 output block (row block p, q-block)

       kron(A[i], S[i])[p*vn + q, r*en + s] = A[i, p, r] * S[i, q, s]
    """
    p = pl.program_id(0)                      # which A row-block this step builds
    s = s_ref[...]                            # (n, block_v, en), load once

    def col_block(r):
        # sum_i A[i, p, r] * S[i, q_block, :]   (A flattened as i*n*n + p*n + r)
        acc = a_ref[p * n + r] * s[0]
        for i in range(1, n):                 # n is tiny (2/4/8): static unroll is fine
            acc = acc + a_ref[i * n * n + p * n + r] * s[i]
        return acc                            # (block_v, en)

    if en % 128 == 0:
        # Lane-aligned direct stores, no concat temp.
        for r in range(n):
            w_ref[0, :, r * en:(r + 1) * en] = col_block(r)
    else:
        # Narrow en: assemble one lane-dense (block_v, E) slab, single store.
        w_ref[0] = jnp.concatenate([col_block(r) for r in range(n)], axis=-1)


def _choose_block_v(vn, n, en):
    """Rows-per-grid-step for the W build: multiple of 8 dividing vn, ~2 MiB block."""
    if vn % 8 != 0:
        return vn                              # full extent (always layout-legal)
    E = n * en
    cap_rows = max(8, (2 * 1024 * 1024) // (E * 4))
    bv = max(8, min(vn, (cap_rows // 8) * 8))
    while vn % bv != 0:
        bv -= 8
    return bv


def build_phm_weight(A, S, emb_size, *, block_v=None):
    """Returns the PHM embedding matrix W (V, E), already scaled by sqrt(emb_size).
       Cache the result across forwards when A/S are parameters reused per step."""
    n = A.shape[0]
    vn, en = S.shape[1], S.shape[2]
    V, E = n * vn, n * en
    assert E == emb_size, "emb_size must equal n * S.shape[2]"

    # Fold sqrt(E) into A (W is linear in A) -> no output-scale epilogue anywhere.
    a_flat = (A.astype(jnp.float32) * math.sqrt(emb_size)).reshape(-1)

    if block_v is None:
        block_v = _choose_block_v(vn, n, en)
    nvb = vn // block_v

    w3 = pl.pallas_call(
        functools.partial(_build_w_kernel, n=n, en=en),
        out_shape=jax.ShapeDtypeStruct((n, vn, E), jnp.float32),
        grid=(n, nvb),
        in_specs=[
            pl.BlockSpec(memory_space=pltpu.MemorySpace.SMEM),            # A (scalars)
            pl.BlockSpec((n, block_v, en), lambda p, q: (0, q, 0)),       # S q-block
        ],
        out_specs=pl.BlockSpec((1, block_v, E), lambda p, q: (p, q, 0)),
        compiler_params=pltpu.CompilerParams(
            dimension_semantics=("parallel", "parallel")),
    )(a_flat, S.astype(jnp.float32))

    # (n, vn, E) -> (V, E): row index p*vn + q, contiguous reshape (free).
    return w3.reshape(V, E)


# --------------------------------------------------------------------------
# Phase 2: embedding gather (DMA rows of W, which stays in HBM)
# --------------------------------------------------------------------------
def _gather_kernel(tok_ref, w_hbm, out_ref, sem, *, tile_bt, bt):
    """tok_ref: SMEM (bt,) int32 token ids (whole array)
       w_hbm : HBM (V, E) f32 (memory_space=pl.ANY; never copied wholesale)
       out_ref: VMEM (tile_bt, E) f32 output block for this grid step
       sem   : single DMA semaphore, shape (1,)
    """
    base = pl.program_id(0) * tile_bt
    nrows = jnp.minimum(tile_bt, bt - base)   # skip padded tail rows

    def _row_copy(j):
        row = tok_ref[base + j]
        return pltpu.make_async_copy(w_hbm.at[pl.ds(row, 1), :],
                                     out_ref.at[pl.ds(j, 1), :],
                                     sem.at[0])

    def _start(j, carry):
        _row_copy(j).start()
        return carry

    def _wait(j, carry):
        # Same descriptor (same row / same size) as the one started above, so
        # the semaphore byte accounting is exact by construction.
        _row_copy(j).wait()
        return carry

    # Issue all row DMAs for this tile (kept in flight together), then drain.
    lax.fori_loop(0, nrows, _start, None)
    lax.fori_loop(0, nrows, _wait, None)


def _round_up(x, m):
    return ((x + m - 1) // m) * m


def phm_token_embedding(tokens, A, S, emb_size, *, tile_bt=None, weight=None):
    """tokens: (B, T) int ; A: (n, n, n) f32 ; S: (n, V//n, E//n) f32.
       Returns (B, T, emb_size) f32.  Pass `weight=` (from build_phm_weight) to
       skip rebuilding W every call."""
    B, T = tokens.shape
    n = A.shape[0]
    vn, en = S.shape[1], S.shape[2]
    V, E = n * vn, n * en
    assert E == emb_size, "emb_size must equal n * S.shape[2]"

    if weight is None:
        weight = build_phm_weight(A, S, emb_size)

    bt = B * T
    if tile_bt is None:
        tile_bt = 256
        while tile_bt > 8 and tile_bt * E * 4 > 4 * 1024 * 1024:
            tile_bt //= 2
        tile_bt = min(tile_bt, _round_up(bt, 8))
    assert tile_bt % 8 == 0, "tile_bt must be a multiple of 8"

    ntiles = -(-bt // tile_bt)
    bt_pad = ntiles * tile_bt

    # Clamp ids so the DMA gather never reads OOB HBM (torch would raise).
    tok = jnp.clip(tokens.astype(jnp.int32).reshape(-1), 0, V - 1)

    out = pl.pallas_call(
        functools.partial(_gather_kernel, tile_bt=tile_bt, bt=bt),
        out_shape=jax.ShapeDtypeStruct((bt_pad, E), jnp.float32),
        grid=(ntiles,),
        in_specs=[
            pl.BlockSpec(memory_space=pltpu.MemorySpace.SMEM),   # token ids
            pl.BlockSpec(memory_space=pl.ANY),                   # W stays in HBM
        ],
        out_specs=pl.BlockSpec((tile_bt, E), lambda i: (i, 0)),
        scratch_shapes=[pltpu.SemaphoreType.DMA((1,))],
        compiler_params=pltpu.CompilerParams(
            dimension_semantics=("parallel",)),
    )(tok, weight)

    return out[:bt].reshape(B, T, E)


# --------------------------------------------------------------------------
# Reference + demo
# --------------------------------------------------------------------------
def _reference(tokens, A, S, emb_size):
    n = A.shape[0]
    V = n * S.shape[1]
    E = n * S.shape[2]
    # W[p*vn+q, r*en+s] = sum_i A[i,p,r] * S[i,q,s]
    W = jnp.einsum('ipr,iqs->pqrs', A, S).reshape(V, E)
    return W[tokens] * math.sqrt(emb_size)


def _xavier_uniform(key, shape):
    # Matches torch.nn.init.xavier_uniform_ fan computation for >=2D tensors.
    receptive = int(np.prod(shape[2:])) if len(shape) > 2 else 1
    fan_in = shape[1] * receptive
    fan_out = shape[0] * receptive
    bound = math.sqrt(6.0 / (fan_in + fan_out))
    return jax.random.uniform(key, shape, jnp.float32, -bound, bound)


if __name__ == "__main__":
    vocab_size = 64
    emb_size = 32
    n = 4
    batch, seq = 2, 8

    key = jax.random.PRNGKey(0)
    k_a, k_s, k_tok = jax.random.split(key, 3)

    A = _xavier_uniform(k_a, (n, n, n))
    S = _xavier_uniform(k_s, (n, vocab_size // n, emb_size // n))
    tokens = jax.random.randint(k_tok, (batch, seq), 0, vocab_size, dtype=jnp.int32)

    out = phm_token_embedding(tokens, A, S, emb_size)
    out = jax.block_until_ready(out)

    ref = _reference(tokens, A, S, emb_size)
    assert out.shape == (batch, seq, emb_size)
    assert np.allclose(np.asarray(out), np.asarray(ref), rtol=1e-4, atol=1e-4), \
        "Pallas output does not match reference"

    print("KERNEL_OK")
</pallas_src>

<mosaic_0001>
module attributes {stable_mosaic.version = 11 : i64} {
  func.func @_build_w_kernel(%arg0: i32, %arg1: i32, %arg2: memref<64xf32, #tpu.memory_space<smem>>, %arg3: memref<4x16x8xf32, #tpu.memory_space<vmem>>, %arg4: memref<1x16x32xf32, #tpu.memory_space<vmem>>) attributes {dimension_semantics = [#tpu.dimension_semantics<parallel>, #tpu.dimension_semantics<parallel>], iteration_bounds = array<i64: 4, 1>, scalar_prefetch = 0 : i64, scratch_operands = 0 : i64, tpu.core_type = #tpu.core_type<tc>, window_params = [{transform_indices = @transform_0, window_bounds = array<i64: 64>}, {transform_indices = @transform_1, window_bounds = array<i64: 4, 16, 8>}, {transform_indices = @transform_2, window_bounds = array<i64: 1, 16, 32>}]} {
    %c0 = arith.constant 0 : index
    %c0_0 = arith.constant 0 : index
    %c0_1 = arith.constant 0 : index
    %0 = vector.load %arg3[%c0, %c0_0, %c0_1] : memref<4x16x8xf32, #tpu.memory_space<vmem>>, vector<4x16x8xf32>
    %c4_i32 = arith.constant 4 : i32
    %1 = arith.muli %arg0, %c4_i32 : i32
    %c0_i32 = arith.constant 0 : i32
    %2 = arith.addi %1, %c0_i32 : i32
    %3 = arith.index_cast %2 : i32 to index
    %4 = memref.load %arg2[%3] : memref<64xf32, #tpu.memory_space<smem>>
    %5 = vector.extract_strided_slice %0 {offsets = [0, 0, 0], sizes = [1, 16, 8], strides = [1, 1, 1]} : vector<4x16x8xf32> to vector<1x16x8xf32>
    %6 = vector.shape_cast %5 : vector<1x16x8xf32> to vector<16x8xf32>
    %7 = vector.broadcast %4 : f32 to vector<16x8xf32>
    %8 = arith.mulf %7, %6 : vector<16x8xf32>
    %c4_i32_2 = arith.constant 4 : i32
    %9 = arith.muli %arg0, %c4_i32_2 : i32
    %c16_i32 = arith.constant 16 : i32
    %10 = arith.addi %c16_i32, %9 : i32
    %c0_i32_3 = arith.constant 0 : i32
    %11 = arith.addi %10, %c0_i32_3 : i32
    %12 = arith.index_cast %11 : i32 to index
    %13 = memref.load %arg2[%12] : memref<64xf32, #tpu.memory_space<smem>>
    %14 = vector.extract_strided_slice %0 {offsets = [1, 0, 0], sizes = [1, 16, 8], strides = [1, 1, 1]} : vector<4x16x8xf32> to vector<1x16x8xf32>
    %15 = vector.shape_cast %14 : vector<1x16x8xf32> to vector<16x8xf32>
    %16 = vector.broadcast %13 : f32 to vector<16x8xf32>
    %17 = arith.mulf %16, %15 : vector<16x8xf32>
    %18 = arith.addf %8, %17 : vector<16x8xf32>
    %c4_i32_4 = arith.constant 4 : i32
    %19 = arith.muli %arg0, %c4_i32_4 : i32
    %c32_i32 = arith.constant 32 : i32
    %20 = arith.addi %c32_i32, %19 : i32
    %c0_i32_5 = arith.constant 0 : i32
    %21 = arith.addi %20, %c0_i32_5 : i32
    %22 = arith.index_cast %21 : i32 to index
    %23 = memref.load %arg2[%22] : memref<64xf32, #tpu.memory_space<smem>>
    %24 = vector.extract_strided_slice %0 {offsets = [2, 0, 0], sizes = [1, 16, 8], strides = [1, 1, 1]} : vector<4x16x8xf32> to vector<1x16x8xf32>
    %25 = vector.shape_cast %24 : vector<1x16x8xf32> to vector<16x8xf32>
    %26 = vector.broadcast %23 : f32 to vector<16x8xf32>
    %27 = arith.mulf %26, %25 : vector<16x8xf32>
    %28 = arith.addf %18, %27 : vector<16x8xf32>
    %c4_i32_6 = arith.constant 4 : i32
    %29 = arith.muli %arg0, %c4_i32_6 : i32
    %c48_i32 = arith.constant 48 : i32
    %30 = arith.addi %c48_i32, %29 : i32
    %c0_i32_7 = arith.constant 0 : i32
    %31 = arith.addi %30, %c0_i32_7 : i32
    %32 = arith.index_cast %31 : i32 to index
    %33 = memref.load %arg2[%32] : memref<64xf32, #tpu.memory_space<smem>>
    %34 = vector.extract_strided_slice %0 {offsets = [3, 0, 0], sizes = [1, 16, 8], strides = [1, 1, 1]} : vector<4x16x8xf32> to vector<1x16x8xf32>
    %35 = vector.shape_cast %34 : vector<1x16x8xf32> to vector<16x8xf32>
    %36 = vector.broadcast %33 : f32 to vector<16x8xf32>
    %37 = arith.mulf %36, %35 : vector<16x8xf32>
    %38 = arith.addf %28, %37 : vector<16x8xf32>
    %c4_i32_8 = arith.constant 4 : i32
    %39 = arith.muli %arg0, %c4_i32_8 : i32
    %c1_i32 = arith.constant 1 : i32
    %40 = arith.addi %39, %c1_i32 : i32
    %41 = arith.index_cast %40 : i32 to index
    %42 = memref.load %arg2[%41] : memref<64xf32, #tpu.memory_space<smem>>
    %43 = vector.extract_strided_slice %0 {offsets = [0, 0, 0], sizes = [1, 16, 8], strides = [1, 1, 1]} : vector<4x16x8xf32> to vector<1x16x8xf32>
    %44 = vector.shape_cast %43 : vector<1x16x8xf32> to vector<16x8xf32>
    %45 = vector.broadcast %42 : f32 to vector<16x8xf32>
    %46 = arith.mulf %45, %44 : vector<16x8xf32>
    %c4_i32_9 = arith.constant 4 : i32
    %47 = arith.muli %arg0, %c4_i32_9 : i32
    %c16_i32_10 = arith.constant 16 : i32
    %48 = arith.addi %c16_i32_10, %47 : i32
    %c1_i32_11 = arith.constant 1 : i32
    %49 = arith.addi %48, %c1_i32_11 : i32
    %50 = arith.index_cast %49 : i32 to index
    %51 = memref.load %arg2[%50] : memref<64xf32, #tpu.memory_space<smem>>
    %52 = vector.extract_strided_slice %0 {offsets = [1, 0, 0], sizes = [1, 16, 8], strides = [1, 1, 1]} : vector<4x16x8xf32> to vector<1x16x8xf32>
    %53 = vector.shape_cast %52 : vector<1x16x8xf32> to vector<16x8xf32>
    %54 = vector.broadcast %51 : f32 to vector<16x8xf32>
    %55 = arith.mulf %54, %53 : vector<16x8xf32>
    %56 = arith.addf %46, %55 : vector<16x8xf32>
    %c4_i32_12 = arith.constant 4 : i32
    %57 = arith.muli %arg0, %c4_i32_12 : i32
    %c32_i32_13 = arith.constant 32 : i32
    %58 = arith.addi %c32_i32_13, %57 : i32
    %c1_i32_14 = arith.constant 1 : i32
    %59 = arith.addi %58, %c1_i32_14 : i32
    %60 = arith.index_cast %59 : i32 to index
    %61 = memref.load %arg2[%60] : memref<64xf32, #tpu.memory_space<smem>>
    %62 = vector.extract_strided_slice %0 {offsets = [2, 0, 0], sizes = [1, 16, 8], strides = [1, 1, 1]} : vector<4x16x8xf32> to vector<1x16x8xf32>
    %63 = vector.shape_cast %62 : vector<1x16x8xf32> to vector<16x8xf32>
    %64 = vector.broadcast %61 : f32 to vector<16x8xf32>
    %65 = arith.mulf %64, %63 : vector<16x8xf32>
    %66 = arith.addf %56, %65 : vector<16x8xf32>
    %c4_i32_15 = arith.constant 4 : i32
    %67 = arith.muli %arg0, %c4_i32_15 : i32
    %c48_i32_16 = arith.constant 48 : i32
    %68 = arith.addi %c48_i32_16, %67 : i32
    %c1_i32_17 = arith.constant 1 : i32
    %69 = arith.addi %68, %c1_i32_17 : i32
    %70 = arith.index_cast %69 : i32 to index
    %71 = memref.load %arg2[%70] : memref<64xf32, #tpu.memory_space<smem>>
    %72 = vector.extract_strided_slice %0 {offsets = [3, 0, 0], sizes = [1, 16, 8], strides = [1, 1, 1]} : vector<4x16x8xf32> to vector<1x16x8xf32>
    %73 = vector.shape_cast %72 : vector<1x16x8xf32> to vector<16x8xf32>
    %74 = vector.broadcast %71 : f32 to vector<16x8xf32>
    %75 = arith.mulf %74, %73 : vector<16x8xf32>
    %76 = arith.addf %66, %75 : vector<16x8xf32>
    %c4_i32_18 = arith.constant 4 : i32
    %77 = arith.muli %arg0, %c4_i32_18 : i32
    %c2_i32 = arith.constant 2 : i32
    %78 = arith.addi %77, %c2_i32 : i32
    %79 = arith.index_cast %78 : i32 to index
    %80 = memref.load %arg2[%79] : memref<64xf32, #tpu.memory_space<smem>>
    %81 = vector.extract_strided_slice %0 {offsets = [0, 0, 0], sizes = [1, 16, 8], strides = [1, 1, 1]} : vector<4x16x8xf32> to vector<1x16x8xf32>
    %82 = vector.shape_cast %81 : vector<1x16x8xf32> to vector<16x8xf32>
    %83 = vector.broadcast %80 : f32 to vector<16x8xf32>
    %84 = arith.mulf %83, %82 : vector<16x8xf32>
    %c4_i32_19 = arith.constant 4 : i32
    %85 = arith.muli %arg0, %c4_i32_19 : i32
    %c16_i32_20 = arith.constant 16 : i32
    %86 = arith.addi %c16_i32_20, %85 : i32
    %c2_i32_21 = arith.constant 2 : i32
    %87 = arith.addi %86, %c2_i32_21 : i32
    %88 = arith.index_cast %87 : i32 to index
    %89 = memref.load %arg2[%88] : memref<64xf32, #tpu.memory_space<smem>>
    %90 = vector.extract_strided_slice %0 {offsets = [1, 0, 0], sizes = [1, 16, 8], strides = [1, 1, 1]} : vector<4x16x8xf32> to vector<1x16x8xf32>
    %91 = vector.shape_cast %90 : vector<1x16x8xf32> to vector<16x8xf32>
    %92 = vector.broadcast %89 : f32 to vector<16x8xf32>
    %93 = arith.mulf %92, %91 : vector<16x8xf32>
    %94 = arith.addf %84, %93 : vector<16x8xf32>
    %c4_i32_22 = arith.constant 4 : i32
    %95 = arith.muli %arg0, %c4_i32_22 : i32
    %c32_i32_23 = arith.constant 32 : i32
    %96 = arith.addi %c32_i32_23, %95 : i32
    %c2_i32_24 = arith.constant 2 : i32
    %97 = arith.addi %96, %c2_i32_24 : i32
    %98 = arith.index_cast %97 : i32 to index
    %99 = memref.load %arg2[%98] : memref<64xf32, #tpu.memory_space<smem>>
    %100 = vector.extract_strided_slice %0 {offsets = [2, 0, 0], sizes = [1, 16, 8], strides = [1, 1, 1]} : vector<4x16x8xf32> to vector<1x16x8xf32>
    %101 = vector.shape_cast %100 : vector<1x16x8xf32> to vector<16x8xf32>
    %102 = vector.broadcast %99 : f32 to vector<16x8xf32>
    %103 = arith.mulf %102, %101 : vector<16x8xf32>
    %104 = arith.addf %94, %103 : vector<16x8xf32>
    %c4_i32_25 = arith.constant 4 : i32
    %105 = arith.muli %arg0, %c4_i32_25 : i32
    %c48_i32_26 = arith.constant 48 : i32
    %106 = arith.addi %c48_i32_26, %105 : i32
    %c2_i32_27 = arith.constant 2 : i32
    %107 = arith.addi %106, %c2_i32_27 : i32
    %108 = arith.index_cast %107 : i32 to index
    %109 = memref.load %arg2[%108] : memref<64xf32, #tpu.memory_space<smem>>
    %110 = vector.extract_strided_slice %0 {offsets = [3, 0, 0], sizes = [1, 16, 8], strides = [1, 1, 1]} : vector<4x16x8xf32> to vector<1x16x8xf32>
    %111 = vector.shape_cast %110 : vector<1x16x8xf32> to vector<16x8xf32>
    %112 = vector.broadcast %109 : f32 to vector<16x8xf32>
    %113 = arith.mulf %112, %111 : vector<16x8xf32>
    %114 = arith.addf %104, %113 : vector<16x8xf32>
    %c4_i32_28 = arith.constant 4 : i32
    %115 = arith.muli %arg0, %c4_i32_28 : i32
    %c3_i32 = arith.constant 3 : i32
    %116 = arith.addi %115, %c3_i32 : i32
    %117 = arith.index_cast %116 : i32 to index
    %118 = memref.load %arg2[%117] : memref<64xf32, #tpu.memory_space<smem>>
    %119 = vector.extract_strided_slice %0 {offsets = [0, 0, 0], sizes = [1, 16, 8], strides = [1, 1, 1]} : vector<4x16x8xf32> to vector<1x16x8xf32>
    %120 = vector.shape_cast %119 : vector<1x16x8xf32> to vector<16x8xf32>
    %121 = vector.broadcast %118 : f32 to vector<16x8xf32>
    %122 = arith.mulf %121, %120 : vector<16x8xf32>
    %c4_i32_29 = arith.constant 4 : i32
    %123 = arith.muli %arg0, %c4_i32_29 : i32
    %c16_i32_30 = arith.constant 16 : i32
    %124 = arith.addi %c16_i32_30, %123 : i32
    %c3_i32_31 = arith.constant 3 : i32
    %125 = arith.addi %124, %c3_i32_31 : i32
    %126 = arith.index_cast %125 : i32 to index
    %127 = memref.load %arg2[%126] : memref<64xf32, #tpu.memory_space<smem>>
    %128 = vector.extract_strided_slice %0 {offsets = [1, 0, 0], sizes = [1, 16, 8], strides = [1, 1, 1]} : vector<4x16x8xf32> to vector<1x16x8xf32>
    %129 = vector.shape_cast %128 : vector<1x16x8xf32> to vector<16x8xf32>
    %130 = vector.broadcast %127 : f32 to vector<16x8xf32>
    %131 = arith.mulf %130, %129 : vector<16x8xf32>
    %132 = arith.addf %122, %131 : vector<16x8xf32>
    %c4_i32_32 = arith.constant 4 : i32
    %133 = arith.muli %arg0, %c4_i32_32 : i32
    %c32_i32_33 = arith.constant 32 : i32
    %134 = arith.addi %c32_i32_33, %133 : i32
    %c3_i32_34 = arith.constant 3 : i32
    %135 = arith.addi %134, %c3_i32_34 : i32
    %136 = arith.index_cast %135 : i32 to index
    %137 = memref.load %arg2[%136] : memref<64xf32, #tpu.memory_space<smem>>
    %138 = vector.extract_strided_slice %0 {offsets = [2, 0, 0], sizes = [1, 16, 8], strides = [1, 1, 1]} : vector<4x16x8xf32> to vector<1x16x8xf32>
    %139 = vector.shape_cast %138 : vector<1x16x8xf32> to vector<16x8xf32>
    %140 = vector.broadcast %137 : f32 to vector<16x8xf32>
    %141 = arith.mulf %140, %139 : vector<16x8xf32>
    %142 = arith.addf %132, %141 : vector<16x8xf32>
    %c4_i32_35 = arith.constant 4 : i32
    %143 = arith.muli %arg0, %c4_i32_35 : i32
    %c48_i32_36 = arith.constant 48 : i32
    %144 = arith.addi %c48_i32_36, %143 : i32
    %c3_i32_37 = arith.constant 3 : i32
    %145 = arith.addi %144, %c3_i32_37 : i32
    %146 = arith.index_cast %145 : i32 to index
    %147 = memref.load %arg2[%146] : memref<64xf32, #tpu.memory_space<smem>>
    %148 = vector.extract_strided_slice %0 {offsets = [3, 0, 0], sizes = [1, 16, 8], strides = [1, 1, 1]} : vector<4x16x8xf32> to vector<1x16x8xf32>
    %149 = vector.shape_cast %148 : vector<1x16x8xf32> to vector<16x8xf32>
    %150 = vector.broadcast %147 : f32 to vector<16x8xf32>
    %151 = arith.mulf %150, %149 : vector<16x8xf32>
    %152 = arith.addf %142, %151 : vector<16x8xf32>
    %153 = tpu.concatenate %38, %76, %114, %152 in 1 : vector<16x8xf32>, vector<16x8xf32>, vector<16x8xf32>, vector<16x8xf32> -> vector<16x32xf32>
    %c0_38 = arith.constant 0 : index
    %c0_39 = arith.constant 0 : index
    %c0_40 = arith.constant 0 : index
    %154 = vector.load %arg4[%c0_38, %c0_39, %c0_40] : memref<1x16x32xf32, #tpu.memory_space<vmem>>, vector<1x16x32xf32>
    %155 = vector.shape_cast %154 : vector<1x16x32xf32> to vector<16x32xf32>
    %156 = vector.shape_cast %153 : vector<16x32xf32> to vector<1x16x32xf32>
    tpu.vector_store %arg4[%c0_38, %c0_39, %c0_40], %156 {strides = array<i32>} : memref<1x16x32xf32, #tpu.memory_space<vmem>>, vector<1x16x32xf32>,
    return
  }
  func.func @transform_0(%arg0: i32, %arg1: i32) -> i32 {
    %c0_i32 = arith.constant 0 : i32
    %c0_i32_0 = arith.constant 0 : i32
    return %c0_i32 : i32
  }
  func.func @transform_1(%arg0: i32, %arg1: i32) -> (i32, i32, i32) {
    %c0_i32 = arith.constant 0 : i32
    %c0_i32_0 = arith.constant 0 : i32
    %c0_i32_1 = arith.constant 0 : i32
    return %c0_i32, %arg1, %c0_i32_0 : i32, i32, i32
  }
  func.func @transform_2(%arg0: i32, %arg1: i32) -> (i32, i32, i32) {
    %c0_i32 = arith.constant 0 : i32
    %c0_i32_0 = arith.constant 0 : i32
    return %arg0, %arg1, %c0_i32 : i32, i32, i32
  }
}

</mosaic_0001>

<bundles_post_ra>
// kernel: tpu_custom_call.1
= control target key start
LH: loop header
LB: loop body
LE: loop exit
PB: predicated region body
PF: predicated region fallthrough
CT: control target
= control target key end

     0   :  { %7 = vsyncpa [#allocation4], 0  ;;  %s871_s0 = inlined_call_operand.vmem [shape: f32[64], index: 0, kind: input, shape index: {}]   ;;  %s872_s1 = inlined_call_operand.vmem [shape: f32[4,16,8], index: 1, kind: input, shape index: {}]   ;;  %s873_s2 = inlined_call_operand.hbm [shape: f32[4,16,32], index: 2, kind: output, shape index: {}]  }
   0x1   :  { %8 = vsyncpa [#allocation3], 0 }
   0x2   :  { %10 = vsyncpa [#allocation3 + $0x1], 0  ;;  %s631_s9 = smov 0   ;;  %s633_s10 = smov 0  }
   0x3   :  { %s635_s11 = smov 0   ;;  %s637_s12 = smov 0  }
   0x4   :  { %s639_s13 = smov 0   ;;  %s641_s14 = smov 0  }
   0x5 LB: > { %s427_s15 = sadd.s32 4294967295, %s609_s14   ;;  %s428_s16 = sadd.s32 4294967294, %s609_s14   ;;  %s609_s14 = sphi %s641_s14, %s16_s14   ;;  %s605_s13 = sphi %s639_s13, %s880_s13   ;;  %s601_s12 = sphi %s637_s12, %s879_s12   ;;  %s597_s11 = sphi %s635_s11, %s878_s11   ;;  %s593_s10 = sphi %s633_s10, %s877_s10   ;;  %s589_s9 = sphi %s631_s9, %s876_s9  }
   0x6   : > { %s28_s17 = sadd.s32 1, %s605_s13  ;;  %s84_s18 = sadd.s32 1, %s597_s11 }
   0x7   : > { %p30_p0 = scmp.ge.s32.totalorder %s28_s17, 4  ;;  %p94_p1 = scmp.ne.s32.totalorder %s597_s11, %s593_s10 }
   0x8   : > { %p95_p2 = scmp.eq.s32.totalorder %s427_s15, 3  ;;  %p100_p3 = scmp.ne.s32.totalorder %s593_s10, %s589_s9 }
   0x9   : > { %s882_s17 = smov (%p30_p0, %s28_s17), 0  ;;  %p101_p5 = scmp.eq.s32.totalorder %s428_s16, 3 }
   0xa   : > { %p671_p4 = por %p95_p2, %p94_p1  ;;  %s79_s20 = ssub.s32 %s605_s13, %s882_s17 }
   0xb   : > { %p429_p6 = scmp.ge.s32.totalorder %s609_s14, 1  ;;  %p82_p7 = scmp.eq.s32.totalorder %s79_s20, 0 }
   0xc   : > { %p678_p8 = por %p101_p5, %p100_p3  ;;  %p108_p9 = scmp.lt.s32.totalorder %s609_s14, 5 }
   0xd   : > { %s684_s22 = scalar_select %p82_p7, %s597_s11, %s84_s18  }
   0xe   : > { %p109_p10 = pnand %p429_p6, %p108_p9  ;;  %p456_p11 = scmp.eq.s32.totalorder %s427_s15, 0 }
   0xf   : > { %s120_s25 = sshll.u32 %s871_s0, 4  ;;  %s611_s26 = smov [#allocation2]   ;;  %s121_s25 = int_to_ptr.vmem [resolvable:$true] %s120_s25 }
  0x10   : > { %p448_p12 = pneg %p109_p10  ;;  %142 = sbr.rel (%p109_p10) target bundleno = 175 (0xaf), region = 28 }
  0x12   : > { %p449_p13 = pnand %p456_p11, %p448_p12 }
  0x14   : > { %451 = dma.vmem_to_smem (!%p449_p13), %s121_s25, 16, %s611_s26, [#allocation4]  }
  0x15   : > { %580 = dma.done.wait (%p456_p11), [#allocation4], 16  }
  0x16   : > { %582 = vsyncadd (%p456_p11), [#allocation4], 4294967280 }
  0x17   : > { %149 = sfence }
  0x18   : > { %s690_s27 = sshll.u32 %s601_s12, 2  ;;  %v705_v0 = vld [vmem:[%s872_s1] sm:$0xff]  ;;  %v710_v1 = vld [vmem:[%s872_s1 + $0x8] sm:$0xff]  ;;  %v718_v2 = vld [vmem:[%s872_s1 + $0x10] sm:$0xff]  ;;  %vm309_vm0 = vcmask 64512   ;;  %vm312_vm1 = vcmask 130048  }
  0x19   : > { %s207_s28 = sadd.s32 1, %s690_s27  ;;  %s212_s29 = sadd.s32 17, %s690_s27  ;;  %v723_v3 = vld [vmem:[%s872_s1 + $0x18] sm:$0xff]  ;;  %v731_v4 = vld [vmem:[%s872_s1 + $0x20] sm:$0xff]  ;;  %v738_v6 = vld [vmem:[%s872_s1 + $0x28] sm:$0xff]  ;;  %vm315_vm2 = vcmask 195584  }
  0x1a   : > { %s208_s30 = sld [smem:[#allocation2 + %s207_s28]]  ;;  %s219_s3 = sadd.s32 33, %s690_s27  ;;  %v743_v7 = vld [vmem:[%s872_s1 + $0x30] sm:$0xff]  ;;  %v764_v16 = vld [vmem:[%s872_s1 + $0x38] sm:$0xff]  ;;  %vm318_vm3 = vcmask 261120  }
  0x1b   : > { %s213_s4 = sld [smem:[#allocation2 + %s212_s29]]  ;;  %s226_s5 = sadd.s32 49, %s690_s27 }
  0x1c   : > { %s696_s6 = sld [smem:[#allocation2 + %s219_s3]]  ;;  %s233_s7 = sadd.s32 2, %s690_s27 }
  0x1d   : > { %s699_s8 = sld [smem:[#allocation2 + %s226_s5]]  ;;  %s238_s15 = sadd.s32 18, %s690_s27 }
  0x1e   : > { %s712_s24 = sld [smem:[#allocation2 + %s233_s7]]  ;;  %s245_s25 = sadd.s32 34, %s690_s27 }
  0x1f   : > { %s725_s5 = sld [smem:[#allocation2 + %s238_s15]]  ;;  %s252_s16 = sadd.s32 50, %s690_s27 }
  0x20   : > { %v209_v5 = vstv %s208_s30  ;;  %s733_s7 = sld [smem:[#allocation2 + %s245_s25]]  ;;  %s259_s25 = sadd.s32 3, %s690_s27 }
  0x21   : > { %v210_v8 = vmul.f32 %v209_v5, %v705_v0  ;;  %v211_v9 = vmul.f32 %v209_v5, %v710_v1  ;;  %v214_v10 = vstv %s213_s4  ;;  %s747_s30 = sld [smem:[#allocation2 + %s252_s16]]  ;;  %s264_s3 = sadd.s32 19, %s690_s27 }
  0x22   : > { %v215_v11 = vmul.f32 %v214_v10, %v718_v2  ;;  %v216_v12 = vmul.f32 %v214_v10, %v723_v3  ;;  %v221_v13 = vstv %s696_s6  ;;  %s753_s29 = sld [smem:[#allocation2 + %s259_s25]]  ;;  %s271_s4 = sadd.s32 35, %s690_s27 }
  0x23   : > { %v222_v14 = vmul.f32 %v221_v13, %v731_v4  ;;  %v228_v15 = vstv %s699_s8  ;;  %s758_s18 = sld [smem:[#allocation2 + %s264_s3]]  ;;  %v223_v18 = vmul.f32 %v221_v13, %v738_v6  ;;  %s278_s8 = sadd.s32 51, %s690_s27 }
  0x24   : > { %v217_v17 = vadd.f32 %v215_v11, %v210_v8  ;;  %v229_v19 = vmul.f32 %v228_v15, %v743_v7  ;;  %v235_v20 = vstv %s712_s24  ;;  %s769_s6 = sld [smem:[#allocation2 + %s271_s4]]  ;;  %v218_v24 = vadd.f32 %v216_v12, %v211_v9  ;;  %s186_s24 = sadd.s32 16, %s690_s27 }
  0x25   : > { %v236_v21 = vmul.f32 %v235_v20, %v705_v0  ;;  %v237_v22 = vmul.f32 %v235_v20, %v710_v1  ;;  %v240_v23 = vstv %s725_s5  ;;  %s775_s23 = sld [smem:[#allocation2 + %s278_s8]]  ;;  %v230_v29 = vmul.f32 %v228_v15, %v764_v16  ;;  %s193_s5 = sadd.s32 32, %s690_s27 }
  0x26   : > { %v224_v25 = vadd.f32 %v222_v14, %v217_v17  ;;  %v241_v26 = vmul.f32 %v240_v23, %v718_v2  ;;  %v242_v27 = vmul.f32 %v240_v23, %v723_v3  ;;  %v247_v28 = vstv %s733_s7  ;;  %s784_s26 = sld [smem:[#allocation2 + %s186_s24]]  ;;  %s200_s7 = sadd.s32 48, %s690_s27 }
  0x27   : > { %v248_v30 = vmul.f32 %v247_v28, %v731_v4  ;;  %v254_v31 = vstv %s747_s30  ;;  %v249_v34 = vmul.f32 %v247_v28, %v738_v6  ;;  %s789_s28 = sld [smem:[#allocation2 + %s193_s5]]  ;;  %v225_v36 = vadd.f32 %v223_v18, %v218_v24  ;;  %s612_s30 = smov 8  }
  0x28   : > { %v231_v32 = vadd.f32 %v229_v19, %v224_v25  ;;  %v243_v33 = vadd.f32 %v241_v26, %v236_v21  ;;  %v255_v35 = vmul.f32 %v254_v31, %v743_v7  ;;  %v244_v37 = vadd.f32 %v242_v27, %v237_v22  ;;  %s794_s15 = sld [smem:[#allocation2 + %s200_s7]]  ;;  %s613_s25 = smov 16  }
  0x29   : > { %v261_v38 = vstv %s753_s29  ;;  %v266_v39 = vstv %s758_s18  ;;  %v256_v47 = vmul.f32 %v254_v31, %v764_v16  ;;  %v232_v51 = vadd.f32 %v230_v29, %v225_v36  ;;  %s614_s29 = smov 24   ;;  %s182_s3 = sld [smem:[#allocation2 + %s690_s27]] }
  0x2a   : > { %287 = vrot.lane.b32.xlu0 %v231_v32, %s612_s30  ;;  %v250_v40 = vadd.f32 %v248_v30, %v243_v33  ;;  %v262_v41 = vmul.f32 %v261_v38, %v705_v0  ;;  %v263_v42 = vmul.f32 %v261_v38, %v710_v1  ;;  %v267_v43 = vmul.f32 %v266_v39, %v718_v2  ;;  %s163_s18 = sand.u32 1, %s593_s10   ;;  %s441_s4 = sshll.u32 %s601_s12, 4 }
  0x2b   : > { %v268_v44 = vmul.f32 %v266_v39, %v723_v3  ;;  %v273_v45 = vstv %s769_s6  ;;  %v280_v46 = vstv %s775_s23  ;;  %v251_v52 = vadd.f32 %v249_v34, %v244_v37  ;;  %s434_s27 = sshll.u32 %s163_s18, 4  ;;  %s335_s8 = scalar_lea.hbm %s873_s2, %s441_s4 }
  0x2c   : > { %v257_v48 = vadd.f32 %v255_v35, %v250_v40  ;;  %v269_v49 = vadd.f32 %v267_v43, %v262_v41  ;;  %v274_v50 = vmul.f32 %v273_v45, %v731_v4  ;;  %v275_v53 = vmul.f32 %v273_v45, %v738_v6  ;;  %s165_s20 = scalar_lea.vmem [#allocation5], %s434_s27  ;;  %s338_s24 = sshll.u32 %s335_s8, 4  ;;  %s339_s24 = int_to_ptr.hbm [resolvable:$true] %s338_s24 }
  0x2d   : > { %v281_v54 = vmul.f32 %v280_v46, %v743_v7  ;;  %v270_v56 = vadd.f32 %v268_v44, %v263_v42  ;;  %v188_v57 = vstv %s784_s26  ;;  %v195_v58 = vstv %s789_s28  ;;  %s336_s23 = sshll.u32 %s165_s20, 4  ;;  %s322_s12 = scalar_lea.sflag [#allocation3], %s163_s18  ;;  %s337_s23 = int_to_ptr.vmem [resolvable:$true] %s336_s23 }
  0x2e   : > { %295 = vrot.lane.b32.xlu1 %v257_v48, %s613_s25  ;;  %v276_v55 = vadd.f32 %v274_v50, %v269_v49  ;;  %v189_v59 = vmul.f32 %v188_v57, %v718_v2  ;;  %v196_v60 = vmul.f32 %v195_v58, %v731_v4  ;;  %v202_v61 = vstv %s794_s15  ;;  %s541_s26 = sshra.s32 %s339_s24, 4  ;;  %s547_s15 = scalar_lea.hbm %s873_s2, 64  ;;  %s542_s26 = int_to_ptr.hbm [resolvable:$true] %s541_s26 }
  0x2f   : > { %v203_v63 = vmul.f32 %v202_v61, %v743_v7  ;;  %v258_v5 = vadd.f32 %v256_v47, %v251_v52  ;;  %v282_v8 = vmul.f32 %v280_v46, %v764_v16  ;;  %v277_v9 = vadd.f32 %v275_v53, %v270_v56  ;;  %s543_s5 = scalar_lea.hbm %s542_s26, 16  ;;  %p548_p3 = scmp.lt.s32.totalorder %s542_s26, %s873_s2 }
  0x30   : > { %v283_v62 = vadd.f32 %v281_v54, %v276_v55  ;;  %v183_v2 = vstv %s182_s3  ;;  %v190_v14 = vmul.f32 %v188_v57, %v723_v3  ;;  %v197_v17 = vmul.f32 %v195_v58, %v738_v6  ;;  %p544_p0 = scmp.ne.s32.totalorder %s542_s26, %s543_s5  ;;  %p549_p5 = scmp.lt.s32.totalorder %s547_s15, %s543_s5 }
  0x31   : > { %v284_v10 = vadd.f32 %v282_v8, %v277_v9  ;;  %v184_v4 = vmul.f32 %v183_v2, %v705_v0  ;;  %v185_v13 = vmul.f32 %v183_v2, %v710_v1  ;;  %v204_v21 = vmul.f32 %v202_v61, %v764_v16 }
  0x32   : > { %289 = vrot.lane.b32.xlu0 %v232_v51, %s612_s30  ;;  %303 = vrot.lane.b32.xlu2 %v283_v62, %s614_s29  ;;  %p545_p1 = pnand %p544_p0, %p671_p4  ;;  %p550_p6 = por %p549_p5, %p548_p3 }
  0x33   : > { %v191_v11 = vadd.f32 %v189_v59, %v184_v4  ;;  %v192_v15 = vadd.f32 %v190_v14, %v185_v13 }
  0x34   : > { %p546_p2 = pneg %p545_p1 }
  0x35   : > { %v198_v12 = vadd.f32 %v196_v60, %v191_v11  ;;  %v199_v0 = vadd.f32 %v197_v17, %v192_v15 }
  0x36   : > { %297 = vrot.lane.b32.xlu1 %v258_v5, %s613_s25  ;;  %p551_p7 = pnand %p550_p6, %p546_p2 }
  0x37   : > { %v205_v7 = vadd.f32 %v203_v63, %v198_v12  ;;  %v206_v6 = vadd.f32 %v204_v21, %v199_v0 }
  0x3a   : > { %305 = vrot.lane.b32.xlu2 %v284_v10, %s614_s29 }
  0x8c   : > { %v304_v19 = vpop.permute.xlu2 %303 }
  0x94   : > { %v306_v24 = vpop.permute.xlu2 %305 }
  0x9c   : > { %v288_v18 = vpop.permute.xlu0 %287 }
  0x9d   : > { %v310_v20 = vsel %vm309_vm0, %v205_v7, %v288_v18 }
  0xa0   : > { %v296_v1 = vpop.permute.xlu1 %295 }
  0xa1   : > { %v313_v3 = vsel %vm312_vm1, %v310_v20, %v296_v1 }
  0xa2   : > { %v316_v22 = vsel %vm315_vm2, %v313_v3, %v304_v19 }
  0xa3   : > { %319 = vst.msk [vmem:[%s165_s20] sm:$0xff] %vm318_vm3, %v316_v22 }
  0xa4   : > { %v290_v23 = vpop.permute.xlu0 %289 }
  0xa5   : > { %v311_v16 = vsel %vm309_vm0, %v206_v6, %v290_v23 }
  0xa8   : > { %v298_v25 = vpop.permute.xlu1 %297 }
  0xa9   : > { %v314_v26 = vsel %vm312_vm1, %v311_v16, %v298_v25 }
  0xaa   : > { %v317_v27 = vsel %vm315_vm2, %v314_v26, %v306_v24 }
  0xab   : > { %320 = vst.msk [vmem:[%s165_s20 + $0x8] sm:$0xff] %vm318_vm3, %v317_v27 }
  0xac   : > { %554 = shalt.err (!%p551_p7)
}
  0xad   : > { %s615_s3 = smov 128  }
  0xae   : > { %446 = dma.vmem_to_hbm [thread:$0]  (%p671_p4), %s337_s23, 256, %s339_s24, %s322_s12, %s615_s3, %s615_s3, %s612_s30  }
  0xaf PF: > { %p458_p9 = scmp.ge.s32.totalorder %s609_s14, 2  ;;  %s353_s18 = sand.u32 1, %s589_s9  }
  0xb0   : > { %s354_s27 = scalar_lea.sflag [#allocation3], %s353_s18 }
  0xb1   : > { %p453_p10 = pnand %p458_p9, %p678_p8 }
  0xb3   : > { %p454_p11 = pneg %p453_p10 }
  0xb5   : > { %584 = dma.done.wait (%p454_p11), %s354_s27, 256  }
  0xb6   : > { %586 = vsyncadd (%p454_p11), %s354_s27, 4294967040  ;;  %s16_s14 = sadd.s32 1, %s609_s14   ;;  %s876_s9 = smov %s593_s10 }
  0xb7   : > { %p13_p12 = scmp.ge.s32.totalorder %s16_s14, 6   ;;  %s877_s10 = smov %s597_s11 }
  0xb8   : > { %s878_s11 = smov %s684_s22  ;;  %s879_s12 = smov %s605_s13 }
  0xb9   : > { %s880_s13 = smov %s882_s17  ;;  %15 = sbr.rel (!%p13_p12) target bundleno = 5 (0x5), region = 68 }
  0xbe   :  { %360 = vsyncpa [#allocation3], 1 }
  0xbf   :  { %362 = vsyncpa [#allocation3 + $0x1], 1 }
  0xc0   :  { %363 = vsyncpa [#allocation4], 1 }
  0xc1   :  { %365 = vsyncpa [#allocation4 + $0x1], 1 }

</bundles_post_ra>
